<compile_context>
chip_gen: v6e
topology: v6e:2x2x1
jax: 0.10.0
libtpu: 0.0.40
codegen_flags: <defaults>
</compile_context>

<pallas_src>
import jax
import jax.numpy as jnp
from jax.experimental import pallas as pl
from jax.experimental.pallas import tpu as pltpu


def pnet_kernel(x_ref, w1_ref, b1_ref, w2_ref, b2_ref, w3_ref, b3_ref, o_ref):
    # lin1 (+ eval-mode dropout == identity) + relu
    h = jnp.dot(x_ref[...], w1_ref[...], preferred_element_type=jnp.float32)
    h = jnp.maximum(h + b1_ref[...], 0.0)

    # lin2 (+ eval-mode dropout == identity)
    h = jnp.dot(h.astype(w2_ref.dtype), w2_ref[...],
                preferred_element_type=jnp.float32)
    h = h + b2_ref[...]

    # lin3 + sigmoid (tanh form: transcendental on EUP, no VALU divide)
    h = jnp.dot(h.astype(w3_ref.dtype), w3_ref[...],
                preferred_element_type=jnp.float32)
    h = h + b3_ref[...]
    o_ref[...] = (0.5 * (jnp.tanh(0.5 * h) + 1.0)).astype(o_ref.dtype)


def p_net_forward(x, params, *, block_b=512, mxu_dtype=None):
    """x: [B, z_dim]. params: dict of w1,b1,w2,b2,w3,b3 (f32).

    block_b: batch-tile upper bound. Sized for 128 MiB VMEM chips (v5e/v6e);
             on v7x (64 MiB / TC) re-derive roughly half, or raise
             vmem_limit_bytes via pltpu.CompilerParams.
    mxu_dtype: e.g. jnp.bfloat16 to feed bf16 operands to the MXU (v6e/v7x);
               accumulation stays f32, biases/activations stay f32.
    """
    w1, b1 = params["w1"], params["b1"]
    w2, b2 = params["w2"], params["b2"]
    w3, b3 = params["w3"], params["b3"]
    B, z_dim = x.shape
    N = w1.shape[1]
    X_dim = w3.shape[1]

    if mxu_dtype is not None:
        x = x.astype(mxu_dtype)
        w1, w2, w3 = (w.astype(mxu_dtype) for w in (w1, w2, w3))

    # Batch tile: multiple of 8 (sublane granularity), capped at block_b.
    tb = max(8, min(block_b, ((B + 7) // 8) * 8))
    b_pad = pl.cdiv(B, tb) * tb
    if b_pad != B:
        x = jnp.pad(x, ((0, b_pad - B), (0, 0)))
    grid = (b_pad // tb,)

    x_bytes = jnp.dtype(x.dtype).itemsize
    w_bytes = jnp.dtype(w1.dtype).itemsize
    flops = 2 * b_pad * (z_dim * N + N * N + N * X_dim)
    bytes_accessed = (
        b_pad * z_dim * x_bytes                      # x in
        + b_pad * X_dim * 4                          # out
        + (z_dim * N + N * N + N * X_dim) * w_bytes  # weights
        + (N + N + X_dim) * 4)                       # biases
    cost = pl.CostEstimate(flops=int(flops),
                           transcendentals=int(b_pad * X_dim),
                           bytes_accessed=int(bytes_accessed))

    def resident(shape):
        # Weights/biases: same block every grid step -> DMA'd once, stay in VMEM.
        return pl.BlockSpec(shape, lambda i: (0, 0))

    out = pl.pallas_call(
        pnet_kernel,
        out_shape=jax.ShapeDtypeStruct((b_pad, X_dim), jnp.float32),
        grid=grid,
        in_specs=[
            pl.BlockSpec((tb, z_dim), lambda i: (i, 0)),   # x: batch-tiled
            resident((z_dim, N)), resident((1, N)),        # lin1
            resident((N, N)), resident((1, N)),            # lin2
            resident((N, X_dim)), resident((1, X_dim)),    # lin3
        ],
        out_specs=pl.BlockSpec((tb, X_dim), lambda i: (i, 0)),
        compiler_params=pltpu.CompilerParams(
            dimension_semantics=("parallel",)),            # megacore on v7x
        cost_estimate=cost,
    )(x, w1, b1, w2, b2, w3, b3)
    return out[:B]


def init_params(key, X_dim, N, z_dim):
    """Deterministic init matching nn.Linear shapes (uniform +/- 1/sqrt(fan_in))."""
    ks = jax.random.split(key, 6)

    def lin(kw, kb, fan_in, fan_out):
        bound = 1.0 / jnp.sqrt(fan_in)
        w = jax.random.uniform(kw, (fan_in, fan_out), jnp.float32, -bound, bound)
        b = jax.random.uniform(kb, (1, fan_out), jnp.float32, -bound, bound)
        return w, b

    w1, b1 = lin(ks[0], ks[1], z_dim, N)
    w2, b2 = lin(ks[2], ks[3], N, N)
    w3, b3 = lin(ks[4], ks[5], N, X_dim)
    return {"w1": w1, "b1": b1, "w2": w2, "b2": b2, "w3": w3, "b3": b3}


def p_net_reference(x, params):
    """Pure-JAX reference for correctness check (eval-mode)."""
    h = x @ params["w1"] + params["b1"]
    h = jnp.maximum(h, 0.0)
    h = h @ params["w2"] + params["b2"]
    h = h @ params["w3"] + params["b3"]
    return jax.nn.sigmoid(h)


if __name__ == "__main__":
    # Small shapes consistent with the module: batch=64, z_dim=8, N=32, X_dim=16.
    B, z_dim, N, X_dim = 64, 8, 32, 16

    key = jax.random.PRNGKey(0)
    k_params, k_x = jax.random.split(key)
    params = init_params(k_params, X_dim, N, z_dim)
    x = jax.random.normal(k_x, (B, z_dim), jnp.float32)

    ref = p_net_reference(x, params)

    # f32 path (tight check).
    out = jax.block_until_ready(p_net_forward(x, params, block_b=512))
    assert out.shape == (B, X_dim), out.shape
    assert jnp.allclose(out, ref, atol=1e-5, rtol=1e-5), "f32 mismatch vs reference"

    # bf16-MXU path (v6e/v7x): f32 accumulation, looser tolerance.
    out_bf16 = jax.block_until_ready(
        p_net_forward(x, params, block_b=512, mxu_dtype=jnp.bfloat16))
    assert out_bf16.shape == (B, X_dim), out_bf16.shape
    assert jnp.allclose(out_bf16, ref, atol=5e-2, rtol=5e-2), "bf16 mismatch vs reference"

    print("KERNEL_OK")
</pallas_src>

<mosaic_0001>
module attributes {stable_mosaic.version = 11 : i64} {
  func.func @pnet_kernel(%arg0: i32, %arg1: memref<64x8xf32, #tpu.memory_space<vmem>>, %arg2: memref<8x32xf32, #tpu.memory_space<vmem>>, %arg3: memref<1x32xf32, #tpu.memory_space<vmem>>, %arg4: memref<32x32xf32, #tpu.memory_space<vmem>>, %arg5: memref<1x32xf32, #tpu.memory_space<vmem>>, %arg6: memref<32x16xf32, #tpu.memory_space<vmem>>, %arg7: memref<1x16xf32, #tpu.memory_space<vmem>>, %arg8: memref<64x16xf32, #tpu.memory_space<vmem>>) attributes {dimension_semantics = [#tpu.dimension_semantics<parallel>], iteration_bounds = array<i64: 1>, scalar_prefetch = 0 : i64, scratch_operands = 0 : i64, tpu.core_type = #tpu.core_type<tc>, window_params = [{transform_indices = @transform_0, window_bounds = array<i64: 64, 8>}, {pipeline_mode = #tpu.pipeline_mode<synchronous>, transform_indices = @transform_1, window_bounds = array<i64: 8, 32>}, {pipeline_mode = #tpu.pipeline_mode<synchronous>, transform_indices = @transform_2, window_bounds = array<i64: 1, 32>}, {pipeline_mode = #tpu.pipeline_mode<synchronous>, transform_indices = @transform_3, window_bounds = array<i64: 32, 32>}, {pipeline_mode = #tpu.pipeline_mode<synchronous>, transform_indices = @transform_4, window_bounds = array<i64: 1, 32>}, {pipeline_mode = #tpu.pipeline_mode<synchronous>, transform_indices = @transform_5, window_bounds = array<i64: 32, 16>}, {pipeline_mode = #tpu.pipeline_mode<synchronous>, transform_indices = @transform_6, window_bounds = array<i64: 1, 16>}, {transform_indices = @transform_7, window_bounds = array<i64: 64, 16>}]} {
    %c0 = arith.constant 0 : index
    %c0_0 = arith.constant 0 : index
    %0 = vector.load %arg1[%c0, %c0_0] : memref<64x8xf32, #tpu.memory_space<vmem>>, vector<64x8xf32>
    %c0_1 = arith.constant 0 : index
    %c0_2 = arith.constant 0 : index
    %1 = vector.load %arg2[%c0_1, %c0_2] : memref<8x32xf32, #tpu.memory_space<vmem>>, vector<8x32xf32>
    %cst = arith.constant dense<0.000000e+00> : vector<64x32xf32>
    %2 = tpu.matmul %0, %1, %cst {dimension_numbers = #tpu.dot_dimension_numbers<[1], [0], [0], [1], [0, 0, 1, 1], [], []>} : vector<64x8xf32>, vector<8x32xf32>, vector<64x32xf32> -> vector<64x32xf32>
    %c0_3 = arith.constant 0 : index
    %c0_4 = arith.constant 0 : index
    %3 = vector.load %arg3[%c0_3, %c0_4] : memref<1x32xf32, #tpu.memory_space<vmem>>, vector<1x32xf32>
    %4 = vector.broadcast %3 : vector<1x32xf32> to vector<64x32xf32>
    %5 = arith.addf %2, %4 : vector<64x32xf32>
    %cst_5 = arith.constant 0.000000e+00 : f32
    %6 = vector.broadcast %cst_5 : f32 to vector<64x32xf32>
    %7 = arith.maximumf %5, %6 : vector<64x32xf32>
    %c0_6 = arith.constant 0 : index
    %c0_7 = arith.constant 0 : index
    %8 = vector.load %arg4[%c0_6, %c0_7] : memref<32x32xf32, #tpu.memory_space<vmem>>, vector<32x32xf32>
    %cst_8 = arith.constant dense<0.000000e+00> : vector<64x32xf32>
    %9 = tpu.matmul %7, %8, %cst_8 {dimension_numbers = #tpu.dot_dimension_numbers<[1], [0], [0], [1], [0, 0, 1, 1], [], []>} : vector<64x32xf32>, vector<32x32xf32>, vector<64x32xf32> -> vector<64x32xf32>
    %c0_9 = arith.constant 0 : index
    %c0_10 = arith.constant 0 : index
    %10 = vector.load %arg5[%c0_9, %c0_10] : memref<1x32xf32, #tpu.memory_space<vmem>>, vector<1x32xf32>
    %11 = vector.broadcast %10 : vector<1x32xf32> to vector<64x32xf32>
    %12 = arith.addf %9, %11 : vector<64x32xf32>
    %c0_11 = arith.constant 0 : index
    %c0_12 = arith.constant 0 : index
    %13 = vector.load %arg6[%c0_11, %c0_12] : memref<32x16xf32, #tpu.memory_space<vmem>>, vector<32x16xf32>
    %cst_13 = arith.constant dense<0.000000e+00> : vector<64x16xf32>
    %14 = tpu.matmul %12, %13, %cst_13 {dimension_numbers = #tpu.dot_dimension_numbers<[1], [0], [0], [1], [0, 0, 1, 1], [], []>} : vector<64x32xf32>, vector<32x16xf32>, vector<64x16xf32> -> vector<64x16xf32>
    %c0_14 = arith.constant 0 : index
    %c0_15 = arith.constant 0 : index
    %15 = vector.load %arg7[%c0_14, %c0_15] : memref<1x16xf32, #tpu.memory_space<vmem>>, vector<1x16xf32>
    %16 = vector.broadcast %15 : vector<1x16xf32> to vector<64x16xf32>
    %17 = arith.addf %14, %16 : vector<64x16xf32>
    %cst_16 = arith.constant 5.000000e-01 : f32
    %18 = vector.broadcast %cst_16 : f32 to vector<64x16xf32>
    %19 = arith.mulf %18, %17 : vector<64x16xf32>
    %20 = math.tanh %19 : vector<64x16xf32>
    %cst_17 = arith.constant 1.000000e+00 : f32
    %21 = vector.broadcast %cst_17 : f32 to vector<64x16xf32>
    %22 = arith.addf %20, %21 : vector<64x16xf32>
    %cst_18 = arith.constant 5.000000e-01 : f32
    %23 = vector.broadcast %cst_18 : f32 to vector<64x16xf32>
    %24 = arith.mulf %23, %22 : vector<64x16xf32>
    %c0_19 = arith.constant 0 : index
    %c0_20 = arith.constant 0 : index
    %25 = vector.load %arg8[%c0_19, %c0_20] : memref<64x16xf32, #tpu.memory_space<vmem>>, vector<64x16xf32>
    tpu.vector_store %arg8[%c0_19, %c0_20], %24 {strides = array<i32>} : memref<64x16xf32, #tpu.memory_space<vmem>>, vector<64x16xf32>,
    return
  }
  func.func @transform_0(%arg0: i32) -> (i32, i32) {
    %c0_i32 = arith.constant 0 : i32
    %c0_i32_0 = arith.constant 0 : i32
    return %arg0, %c0_i32 : i32, i32
  }
  func.func @transform_1(%arg0: i32) -> (i32, i32) {
    %c0_i32 = arith.constant 0 : i32
    %c0_i32_0 = arith.constant 0 : i32
    %c0_i32_1 = arith.constant 0 : i32
    return %c0_i32, %c0_i32_0 : i32, i32
  }
  func.func @transform_2(%arg0: i32) -> (i32, i32) {
    %c0_i32 = arith.constant 0 : i32
    %c0_i32_0 = arith.constant 0 : i32
    %c0_i32_1 = arith.constant 0 : i32
    return %c0_i32, %c0_i32_0 : i32, i32
  }
  func.func @transform_3(%arg0: i32) -> (i32, i32) {
    %c0_i32 = arith.constant 0 : i32
    %c0_i32_0 = arith.constant 0 : i32
    %c0_i32_1 = arith.constant 0 : i32
    return %c0_i32, %c0_i32_0 : i32, i32
  }
  func.func @transform_4(%arg0: i32) -> (i32, i32) {
    %c0_i32 = arith.constant 0 : i32
    %c0_i32_0 = arith.constant 0 : i32
    %c0_i32_1 = arith.constant 0 : i32
    return %c0_i32, %c0_i32_0 : i32, i32
  }
  func.func @transform_5(%arg0: i32) -> (i32, i32) {
    %c0_i32 = arith.constant 0 : i32
    %c0_i32_0 = arith.constant 0 : i32
    %c0_i32_1 = arith.constant 0 : i32
    return %c0_i32, %c0_i32_0 : i32, i32
  }
  func.func @transform_6(%arg0: i32) -> (i32, i32) {
    %c0_i32 = arith.constant 0 : i32
    %c0_i32_0 = arith.constant 0 : i32
    %c0_i32_1 = arith.constant 0 : i32
    return %c0_i32, %c0_i32_0 : i32, i32
  }
  func.func @transform_7(%arg0: i32) -> (i32, i32) {
    %c0_i32 = arith.constant 0 : i32
    %c0_i32_0 = arith.constant 0 : i32
    return %arg0, %c0_i32 : i32, i32
  }
}

</mosaic_0001>

<bundles_post_ra>
// kernel: tpu_custom_call.1
= control target key start
LH: loop header
LB: loop body
LE: loop exit
PB: predicated region body
PF: predicated region fallthrough
CT: control target
= control target key end

     0   :  { %vm42_vm0 = vcmask 64512   ;;  %vm191_vm1 = vcmask 261120   ;;  %vm493_vm2 = vcmask 130048   ;;  %s794_s1 = inlined_call_operand.vmem [shape: f32[8,32], index: 1, kind: input, shape index: {}]   ;;  %s795_s0 = inlined_call_operand.vmem [shape: f32[64,8], index: 0, kind: input, shape index: {}]   ;;  %s796_s3 = inlined_call_operand.vmem [shape: f32[32,32], index: 3, kind: input, shape index: {}]   ;;  %s797_s5 = inlined_call_operand.vmem [shape: f32[32,16], index: 5, kind: input, shape index: {}]   ;;  %s798_s2 = inlined_call_operand.vmem [shape: f32[1,32], index: 2, kind: input, shape index: {}]   ;;  %s799_s4 = inlined_call_operand.vmem [shape: f32[1,32], index: 4, kind: input, shape index: {}]   ;;  %s800_s6 = inlined_call_operand.vmem [shape: f32[1,16], index: 6, kind: input, shape index: {}]   ;;  %s801_s7 = inlined_call_operand.vmem [shape: f32[64,16], index: 7, kind: output, shape index: {}]  }
   0x1   :  { %v34_v0 = vld [vmem:[%s794_s1] sm:$0xff]  ;;  %v27_v2 = vld [vmem:[%s795_s0 + $0x8] sm:$0xff]  ;;  %v28_v3 = vld [vmem:[%s795_s0 + $0x10] sm:$0xff] }
   0x2   :  { %v26_v1 = vld [vmem:[%s795_s0] sm:$0xff]  ;;  %566 = vmatprep.subr.mxu0 %v34_v0  ;;  %620 = vmatprep.subr.mxu1 %v34_v0  ;;  %v31_v5 = vld [vmem:[%s795_s0 + $0x28] sm:$0xff]  ;;  %v32_v6 = vld [vmem:[%s795_s0 + $0x30] sm:$0xff] }
   0x3   :  { %568 = vmatprep.mubr.msk.f32.mxu0 %vm42_vm0, %v26_v1  ;;  %v30_v4 = vld [vmem:[%s795_s0 + $0x20] sm:$0xff]  ;;  %567 = vmatpush3.msra.mxu0 %v34_v0  ;;  %v183_v7 = vld [vmem:[%s796_s3 + $0x18] sm:$0xff]  ;;  %v182_v10 = vld [vmem:[%s796_s3 + $0x10] sm:$0xff] }
   0x4   :  { %569 = vmatmul.mubr.msk.f32.vlgmr.msra.gmra.mxu0 %vm42_vm0, %v27_v2  ;;  %621 = vmatpush3.msra.mxu1 %v34_v0  ;;  %v29_v8 = vld [vmem:[%s795_s0 + $0x18] sm:$0xff]  ;;  %v181_v11 = vld [vmem:[%s796_s3 + $0x8] sm:$0xff]  ;;  %v180_v12 = vld [vmem:[%s796_s3] sm:$0xff] }
   0x5   :  { %571 = vmatprep.mubr.msk.f32.mxu0 %vm42_vm0, %v28_v3  ;;  %574 = vmatprep.mubr.msk.f32.mxu1 %vm42_vm0, %v30_v4  ;;  %v33_v9 = vld [vmem:[%s795_s0 + $0x38] sm:$0xff]  ;;  %v323_v14 = vld [vmem:[%s797_s5 + $0x10] sm:$0xff]  ;;  %v506_v15 = vld [vmem:[%s798_s2] ss:$0 sm:$0xff] }
   0x6   :  { %575 = vmatmul.mubr.msk.f32.vlgmr.msra.gmra.mxu1 %vm42_vm0, %v31_v5  ;;  %580 = vmatprep.subr.mxu1 %v183_v7  ;;  %v324_v13 = vld [vmem:[%s797_s5 + $0x18] sm:$0xff]  ;;  %v322_v40 = vld [vmem:[%s797_s5 + $0x8] sm:$0xff]  ;;  %v321_v41 = vld [vmem:[%s797_s5] sm:$0xff] }
   0x7   :  { %577 = vmatprep.mubr.msk.f32.mxu1 %vm42_vm0, %v32_v6  ;;  %581 = vmatpush3.msra.mxu1 %v183_v7  ;;  %v515_v43 = vld [vmem:[%s799_s4] ss:$0 sm:$0xff] }
   0x8   :  { %572 = vmatmul.mubr.msk.f32.gmra.mxu0 %vm42_vm0, %v29_v8  ;;  %582 = vmatprep.subr.mxu1 %v182_v10  ;;  %v524_v59 = vld [vmem:[%s800_s6] ss:$0 sm:$0xff] }
   0x9   :  { %583 = vmatpush3.msra.mxu1 %v182_v10  ;;  %600 = vmatprep.subr.mxu0 %v324_v13 }
   0xa   :  { %578 = vmatmul.mubr.msk.f32.gmra.mxu1 %vm42_vm0, %v33_v9  ;;  %584 = vmatprep.subr.mxu1 %v181_v11 }
   0xb   :  { %585 = vmatpush3.msra.mxu1 %v181_v11  ;;  %601 = vmatpush3.msra.mxu0 %v324_v13 }
   0xc   :  { %586 = vmatprep.subr.mxu1 %v180_v12  ;;  %602 = vmatprep.subr.mxu0 %v323_v14 }
   0xd   :  { %587 = vmatpush3.msra.mxu1 %v180_v12  ;;  %603 = vmatpush3.msra.mxu0 %v323_v14 }
   0xe   :  { %604 = vmatprep.subr.mxu0 %v322_v40 }
   0xf   :  { %605 = vmatpush3.msra.mxu0 %v322_v40 }
  0x10   :  { %606 = vmatprep.subr.mxu0 %v321_v41 }
  0x11   :  { %607 = vmatpush3.msra.mxu0 %v321_v41 }
  0xc4   :  { %v570_v16 = vpop.f32.mrf.mxu0 }
  0xc5   :  { %v139_v17 = vadd.f32 %v570_v16, %v506_v15 }
  0xc6   :  { %v133_v18 = vpop.f32.mrf.mxu0  ;;  %v576_v19 = vpop.f32.mrf.mxu1 }
  0xc7   :  { %v134_v20 = vadd.f32 %v506_v15, %v133_v18  ;;  %v173_v25 = vmax.f32 %v139_v17, 0.0  ;;  %v159_v35 = vadd.f32 %v576_v19, %v506_v15 }
  0xc8   :  { %v573_v21 = vpop.f32.mrf.mxu0  ;;  %v153_v22 = vpop.f32.mrf.mxu1 }
  0xc9   :  { %v172_v23 = vmax.f32 %v134_v20, 0.0  ;;  %v154_v24 = vadd.f32 %v506_v15, %v153_v22  ;;  %v149_v26 = vadd.f32 %v573_v21, %v506_v15  ;;  %v177_v37 = vmax.f32 %v159_v35, 0.0 }
  0xca   :  { %v143_v27 = vpop.f32.mrf.mxu0  ;;  %v579_v28 = vpop.f32.mrf.mxu1 }
  0xcb   :  { %v144_v29 = vadd.f32 %v506_v15, %v143_v27  ;;  %588 = vmatprep.mubr.msk.f32.mxu1 %vm191_vm1, %v172_v23  ;;  %v176_v32 = vmax.f32 %v154_v24, 0.0  ;;  %v175_v34 = vmax.f32 %v149_v26, 0.0  ;;  %v169_v38 = vadd.f32 %v579_v28, %v506_v15 }
  0xcc   :  { %589 = vmatmul.mubr.msk.f32.vlgmr.msra.gmra.mxu1 %vm191_vm1, %v173_v25  ;;  %v163_v30 = vpop.f32.mrf.mxu1 }
  0xcd   :  { %v174_v31 = vmax.f32 %v144_v29, 0.0  ;;  %v164_v33 = vadd.f32 %v506_v15, %v163_v30  ;;  %v179_v39 = vmax.f32 %v169_v38, 0.0 }
  0xcf   :  { %591 = vmatprep.mubr.msk.f32.mxu1 %vm191_vm1, %v174_v31  ;;  %v178_v36 = vmax.f32 %v164_v33, 0.0 }
  0xd0   :  { %592 = vmatmul.mubr.msk.f32.gmra.mxu1 %vm191_vm1, %v175_v34 }
  0xd1   :  { %594 = vmatprep.mubr.msk.f32.mxu1 %vm191_vm1, %v176_v32 }
  0xd4   :  { %595 = vmatmul.mubr.msk.f32.gmra.mxu1 %vm191_vm1, %v177_v37 }
  0xd5   :  { %597 = vmatprep.mubr.msk.f32.mxu1 %vm191_vm1, %v178_v36 }
  0xd8   :  { %598 = vmatmul.mubr.msk.f32.gmra.mxu1 %vm191_vm1, %v179_v39 }
 0x18c   :  { %v590_v42 = vpop.f32.mrf.mxu1 }
 0x18d   :  { %v288_v46 = vadd.f32 %v590_v42, %v515_v43 }
 0x18e   :  { %v282_v44 = vpop.f32.mrf.mxu1 }
 0x18f   :  { %v283_v45 = vadd.f32 %v515_v43, %v282_v44 }
 0x190   :  { %v593_v47 = vpop.f32.mrf.mxu1 }
 0x191   :  { %608 = vmatprep.mubr.msk.f32.mxu0 %vm191_vm1, %v283_v45  ;;  %v298_v50 = vadd.f32 %v593_v47, %v515_v43 }
 0x192   :  { %v292_v48 = vpop.f32.mrf.mxu1  ;;  %609 = vmatmul.mubr.msk.f32.vlgmr.msra.gmra.mxu0 %vm191_vm1, %v288_v46 }
 0x193   :  { %v293_v49 = vadd.f32 %v515_v43, %v292_v48 }
 0x194   :  { %v596_v51 = vpop.f32.mrf.mxu1 }
 0x195   :  { %611 = vmatprep.mubr.msk.f32.mxu0 %vm191_vm1, %v293_v49  ;;  %v308_v54 = vadd.f32 %v596_v51, %v515_v43 }
 0x196   :  { %v302_v52 = vpop.f32.mrf.mxu1  ;;  %612 = vmatmul.mubr.msk.f32.gmra.mxu0 %vm191_vm1, %v298_v50 }
 0x197   :  { %v303_v53 = vadd.f32 %v515_v43, %v302_v52 }
 0x198   :  { %v599_v55 = vpop.f32.mrf.mxu1 }
 0x199   :  { %614 = vmatprep.mubr.msk.f32.mxu0 %vm191_vm1, %v303_v53  ;;  %v318_v58 = vadd.f32 %v599_v55, %v515_v43 }
 0x19a   :  { %v312_v56 = vpop.f32.mrf.mxu1  ;;  %615 = vmatmul.mubr.msk.f32.gmra.mxu0 %vm191_vm1, %v308_v54 }
 0x19b   :  { %v313_v57 = vadd.f32 %v515_v43, %v312_v56 }
 0x19d   :  { %617 = vmatprep.mubr.msk.f32.mxu0 %vm191_vm1, %v313_v57 }
 0x19e   :  { %618 = vmatmul.mubr.msk.f32.gmra.mxu0 %vm191_vm1, %v318_v58 }
 0x252   :  { %v610_v60 = vpop.f32.mrf.mxu0 }
 0x253   :  { %v428_v61 = vadd.f32 %v610_v60, %v524_v59 }
 0x254   :  { %v422_v62 = vpop.f32.mrf.mxu0 }
 0x255   :  { %v462_v63 = vmul.f32 0.5, %v428_v61  ;;  %v423_v0 = vadd.f32 %v524_v59, %v422_v62 }
 0x256   :  { %v613_v1 = vpop.f32.mrf.mxu0 }
 0x257   :  { %622 = vtanh.f32 %v462_v63  ;;  %v461_v2 = vmul.f32 0.5, %v423_v0  ;;  %v438_v3 = vadd.f32 %v613_v1, %v524_v59 }
 0x258   :  { %v432_v4 = vpop.f32.mrf.mxu0 }
 0x259   :  { %624 = vtanh.f32 %v461_v2  ;;  %v464_v5 = vmul.f32 0.5, %v438_v3  ;;  %v433_v6 = vadd.f32 %v524_v59, %v432_v4 }
 0x25a   :  { %v616_v7 = vpop.f32.mrf.mxu0 }
 0x25b   :  { %626 = vtanh.f32 %v464_v5  ;;  %v463_v8 = vmul.f32 0.5, %v433_v6  ;;  %v448_v9 = vadd.f32 %v616_v7, %v524_v59 }
 0x25c   :  { %v442_v10 = vpop.f32.mrf.mxu0 }
 0x25d   :  { %628 = vtanh.f32 %v463_v8  ;;  %v466_v11 = vmul.f32 0.5, %v448_v9  ;;  %v443_v12 = vadd.f32 %v524_v59, %v442_v10 }
 0x25e   :  { %v619_v13 = vpop.f32.mrf.mxu0 }
 0x25f   :  { %630 = vtanh.f32 %v466_v11  ;;  %v465_v14 = vmul.f32 0.5, %v443_v12  ;;  %v458_v15 = vadd.f32 %v619_v13, %v524_v59 }
 0x260   :  { %v452_v16 = vpop.f32.mrf.mxu0 }
 0x261   :  { %632 = vtanh.f32 %v465_v14  ;;  %v468_v17 = vmul.f32 0.5, %v458_v15  ;;  %v453_v18 = vadd.f32 %v524_v59, %v452_v16 }
 0x263   :  { %634 = vtanh.f32 %v468_v17  ;;  %v467_v19 = vmul.f32 0.5, %v453_v18 }
 0x264   :  { %v623_v20 = vpop.eup %622 }
 0x265   :  { %v478_v21 = vadd.f32 1.0, %v623_v20  ;;  %636 = vtanh.f32 %v467_v19 }
 0x266   :  { %v625_v22 = vpop.eup %624 }
 0x267   :  { %v486_v23 = vmul.f32 0.5, %v478_v21  ;;  %v477_v24 = vadd.f32 1.0, %v625_v22 }
 0x268   :  { %v627_v25 = vpop.eup %626 }
 0x269   :  { %495 = vst.msk [vmem:[%s801_s7 + $0x8] sm:$0xff] %vm493_vm2, %v486_v23  ;;  %v485_v26 = vmul.f32 0.5, %v477_v24  ;;  %v480_v27 = vadd.f32 1.0, %v627_v25 }
 0x26a   :  { %v629_v28 = vpop.eup %628 }
 0x26b   :  { %494 = vst.msk [vmem:[%s801_s7] sm:$0xff] %vm493_vm2, %v485_v26  ;;  %v488_v29 = vmul.f32 0.5, %v480_v27  ;;  %v479_v30 = vadd.f32 1.0, %v629_v28 }
 0x26c   :  { %v631_v31 = vpop.eup %630 }
 0x26d   :  { %497 = vst.msk [vmem:[%s801_s7 + $0x18] sm:$0xff] %vm493_vm2, %v488_v29  ;;  %v487_v32 = vmul.f32 0.5, %v479_v30  ;;  %v482_v33 = vadd.f32 1.0, %v631_v31 }
 0x26e   :  { %v633_v34 = vpop.eup %632 }
 0x26f   :  { %496 = vst.msk [vmem:[%s801_s7 + $0x10] sm:$0xff] %vm493_vm2, %v487_v32  ;;  %v490_v35 = vmul.f32 0.5, %v482_v33  ;;  %v481_v36 = vadd.f32 1.0, %v633_v34 }
 0x270   :  { %v635_v37 = vpop.eup %634 }
 0x271   :  { %499 = vst.msk [vmem:[%s801_s7 + $0x28] sm:$0xff] %vm493_vm2, %v490_v35  ;;  %v489_v38 = vmul.f32 0.5, %v481_v36  ;;  %v484_v39 = vadd.f32 1.0, %v635_v37 }
 0x272   :  { %v637_v40 = vpop.eup %636 }
 0x273   :  { %498 = vst.msk [vmem:[%s801_s7 + $0x20] sm:$0xff] %vm493_vm2, %v489_v38  ;;  %v492_v41 = vmul.f32 0.5, %v484_v39  ;;  %v483_v42 = vadd.f32 1.0, %v637_v40 }
 0x275   :  { %501 = vst.msk [vmem:[%s801_s7 + $0x38] sm:$0xff] %vm493_vm2, %v492_v41  ;;  %v491_v43 = vmul.f32 0.5, %v483_v42 }
 0x277   :  { %500 = vst.msk [vmem:[%s801_s7 + $0x30] sm:$0xff] %vm493_vm2, %v491_v43 }

</bundles_post_ra>
